<compile_context>
chip_gen: v7x
topology: tpu7x:2x2x1
jax: 0.10.0
libtpu: 0.0.40
codegen_flags: <defaults>
</compile_context>

<pallas_src>
import numpy as np
import jax
import jax.numpy as jnp
from jax.experimental import pallas as pl
from jax.experimental.pallas import tpu as pltpu

EPS = 1e-5


# ------------------------------ Pallas kernel ------------------------------ #

def _shift_down(x):
    """Rows: y[k] = x[k-1], y[0] = 0."""
    zero = jnp.zeros_like(x[0:1])
    return jnp.concatenate([zero, x[:-1]], axis=0)


def _shift_up(x):
    """Rows: y[k] = x[k+1], y[last] = 0."""
    zero = jnp.zeros_like(x[0:1])
    return jnp.concatenate([x[1:], zero], axis=0)


def _mg_restriction_kernel(u_pe_ref, u_po_ref, f_e_ref, f_o_ref,
                           wa1_ref, wpi_ref, wr_ref, wa2_ref,
                           ba1_ref, bpi_ref, ba2_ref, bnsc_ref, bnsh_ref,
                           u1_ref, fo_ref):
    # Per-batch row slabs; lane dim = W*C (full res) or Wo*C (half res).
    u_pe = u_pe_ref[0]                  # [Ho+1, W*C]  u_pad rows 0,2,... (pad,1,3,..)
    u_po = u_po_ref[0]                  # [Ho+1, W*C]  u_pad rows 1,3,... (0,2,..,pad)
    f_e = f_e_ref[0]                    # [Ho, W*C]    f rows 0,2,...
    f_o = f_o_ref[0]                    # [Ho, W*C]    f rows 1,3,...
    ho = f_e.shape[0]

    def mm(x, w):
        # DEFAULT precision: bf16 MXU passes with f32 accumulation.
        return jnp.dot(x, w, preferred_element_type=jnp.float32)

    pe0, po0 = u_pe[0:ho], u_po[0:ho]
    pe1, po1 = u_pe[1:ho + 1], u_po[1:ho + 1]

    # A1(u): stride-1 3x3 conv, even / odd output rows separately.
    a1_e = (mm(pe0, wa1_ref[0]) + mm(po0, wa1_ref[1]) + mm(pe1, wa1_ref[2])
            + ba1_ref[...])
    a1_o = (mm(po0, wa1_ref[0]) + mm(pe1, wa1_ref[1]) + mm(po1, wa1_ref[2])
            + ba1_ref[...])

    # u1 = Pi(u): stride-2 3x3 conv (height stride via even/odd split,
    # width stride folded into the banded matrices).
    u1 = (mm(pe0, wpi_ref[0]) + mm(po0, wpi_ref[1]) + mm(pe1, wpi_ref[2])
          + bpi_ref[...])
    u1_ref[0] = u1

    # t = f - A1(u): lives only in VMEM / vregs.
    t_e = f_e - a1_e
    t_o = f_o - a1_o

    # r = R(t): stride-2; output row k reads t rows 2k-1, 2k, 2k+1.
    r = mm(_shift_down(t_o), wr_ref[0]) + mm(t_e, wr_ref[1]) + mm(t_o, wr_ref[2])

    # Bn_relu: inference-mode BN folded into scale/shift (R bias folded in).
    # TODO(synk): training-mode batch statistics are not computed here.
    bn = jnp.maximum(r * bnsc_ref[...] + bnsh_ref[...], 0.0)

    # A2(u1): stride-1 3x3 conv on the half-resolution u1.
    a2 = (mm(_shift_down(u1), wa2_ref[0]) + mm(u1, wa2_ref[1])
          + mm(_shift_up(u1), wa2_ref[2]) + ba2_ref[...])

    fo_ref[0] = bn + a2


# --------------------------------- wrapper ---------------------------------- #

def _band_mats(w_oihw, width, stride):
    """Conv weight [Cout, Cin, 3, 3] -> [3, width*Cin, wout*Cout].

    mats[di] maps a fused (w, cin) input row (lane dim) to a fused (wout, cout)
    output row for kernel-row tap di; width taps dj, width stride and width
    zero-padding (by omission) are all folded in.
    """
    cout, cin = int(w_oihw.shape[0]), int(w_oihw.shape[1])
    wout = width if stride == 1 else width // stride
    w_t = jnp.transpose(w_oihw, (2, 3, 1, 0)).astype(jnp.float32)  # [di,dj,ci,co]
    mats = []
    for di in range(3):
        m = jnp.zeros((width * cin, wout * cout), jnp.float32)
        for dj in range(3):
            sel = np.zeros((width, wout), np.float32)
            for wo in range(wout):
                wi = stride * wo + dj - 1
                if 0 <= wi < width:
                    sel[wi, wo] = 1.0
            m = m + jnp.einsum("pq,ij->piqj", jnp.asarray(sel),
                               w_t[di, dj]).reshape(width * cin, wout * cout)
        mats.append(m)
    return jnp.stack(mats, axis=0)


@jax.jit
def mg_restriction_forward(u_nchw, f_nchw, p):
    """Returns (u1, f_new) in NCHW, matching MgRestriction.forward (eval-mode BN)."""
    u = jnp.transpose(u_nchw, (0, 2, 3, 1)).astype(jnp.float32)   # NHWC
    f = jnp.transpose(f_nchw, (0, 2, 3, 1)).astype(jnp.float32)
    B, H, W, C = u.shape
    assert H % 2 == 0 and W % 2 == 0
    Ho, Wo = H // 2, W // 2
    WC, WoC = W * C, Wo * C

    # Fuse (w, c) into the lane dimension.
    u2 = u.reshape(B, H, WC)
    f2 = f.reshape(B, H, WC)

    # Even/odd split of the height-padded u (1x copy; replaces the 9x im2col).
    #   u_pe[k] = u_pad[2k]   = {pad, u[1], u[3], ...}
    #   u_po[k] = u_pad[2k+1] = {u[0], u[2], ..., u[H-2], pad}
    zrow = jnp.zeros((B, 1, WC), jnp.float32)
    u_pe = jnp.concatenate([zrow, u2[:, 1::2, :]], axis=1)    # [B, Ho+1, WC]
    u_po = jnp.concatenate([u2[:, 0::2, :], zrow], axis=1)    # [B, Ho+1, WC]
    f_e = f2[:, 0::2, :]                                      # [B, Ho, WC]
    f_o = f2[:, 1::2, :]                                      # [B, Ho, WC]

    # Banded conv matrices over the fused lane dimension (tiny, built per call).
    wa1 = _band_mats(p["A1_w"], W, 1)       # [3, WC,  WC ]
    wpi = _band_mats(p["Pi_w"], W, 2)       # [3, WC,  WoC]
    wr = _band_mats(p["R_w"], W, 2)         # [3, WC,  WoC]
    wa2 = _band_mats(p["A2_w"], Wo, 1)      # [3, WoC, WoC]

    # Biases / BN folded into per-lane vectors.
    ba1 = jnp.tile(p["A1_b"], W).reshape(1, WC)
    bpi = jnp.tile(p["Pi_b"], Wo).reshape(1, WoC)
    ba2 = jnp.tile(p["A2_b"], Wo).reshape(1, WoC)
    scale = p["bn_gamma"] * jax.lax.rsqrt(p["bn_var"] + EPS)
    shift = p["bn_beta"] - p["bn_mean"] * scale
    bnsc = jnp.tile(scale, Wo).reshape(1, WoC)
    bnsh = jnp.tile(p["R_b"] * scale + shift, Wo).reshape(1, WoC)  # R bias folded

    per_b = lambda r, n: pl.BlockSpec((1, r, n), lambda b: (b, 0, 0))
    cst3 = lambda s: pl.BlockSpec(s, lambda b: (0, 0, 0))
    cst2 = lambda s: pl.BlockSpec(s, lambda b: (0, 0))

    u1_rows, f_rows = pl.pallas_call(
        _mg_restriction_kernel,
        out_shape=(jax.ShapeDtypeStruct((B, Ho, WoC), jnp.float32),
                   jax.ShapeDtypeStruct((B, Ho, WoC), jnp.float32)),
        grid=(B,),
        in_specs=[per_b(Ho + 1, WC), per_b(Ho + 1, WC),
                  per_b(Ho, WC), per_b(Ho, WC),
                  cst3((3, WC, WC)), cst3((3, WC, WoC)),
                  cst3((3, WC, WoC)), cst3((3, WoC, WoC)),
                  cst2((1, WC)), cst2((1, WoC)), cst2((1, WoC)),
                  cst2((1, WoC)), cst2((1, WoC))],
        out_specs=(per_b(Ho, WoC), per_b(Ho, WoC)),
        compiler_params=pltpu.CompilerParams(
            dimension_semantics=("parallel",)),     # batch steps -> both TCs
    )(u_pe, u_po, f_e, f_o, wa1, wpi, wr, wa2, ba1, bpi, ba2, bnsc, bnsh)

    u1 = u1_rows.reshape(B, Ho, Wo, C)
    f_new = f_rows.reshape(B, Ho, Wo, C)
    return (jnp.transpose(u1, (0, 3, 1, 2)),
            jnp.transpose(f_new, (0, 3, 1, 2)))


# ------------------------------ pure-JAX reference -------------------------- #

def _conv3x3_ref(x_nhwc, w_oihw, b, stride):
    w_hwio = jnp.transpose(w_oihw, (2, 3, 1, 0))
    y = jax.lax.conv_general_dilated(
        x_nhwc, w_hwio, window_strides=(stride, stride),
        padding=((1, 1), (1, 1)),
        dimension_numbers=("NHWC", "HWIO", "NHWC"),
        precision=jax.lax.Precision.HIGHEST)
    return y + b


def mg_restriction_ref(u_nchw, f_nchw, p):
    u = jnp.transpose(u_nchw, (0, 2, 3, 1)).astype(jnp.float32)
    f = jnp.transpose(f_nchw, (0, 2, 3, 1)).astype(jnp.float32)
    a1u = _conv3x3_ref(u, p["A1_w"], p["A1_b"], 1)
    u1 = _conv3x3_ref(u, p["Pi_w"], p["Pi_b"], 2)
    r = _conv3x3_ref(f - a1u, p["R_w"], p["R_b"], 2)
    bn = ((r - p["bn_mean"]) * jax.lax.rsqrt(p["bn_var"] + EPS)
          * p["bn_gamma"] + p["bn_beta"])
    f_new = jnp.maximum(bn, 0.0) + _conv3x3_ref(u1, p["A2_w"], p["A2_b"], 1)
    return (jnp.transpose(u1, (0, 3, 1, 2)),
            jnp.transpose(f_new, (0, 3, 1, 2)))


# ---------------------------------- main ------------------------------------ #

def make_params(key, C):
    ks = jax.random.split(key, 12)
    def cw(k):
        return 0.1 * jax.random.normal(k, (C, C, 3, 3), jnp.float32)  # OIHW
    def cb(k):
        return 0.1 * jax.random.normal(k, (C,), jnp.float32)
    return {
        "A1_w": cw(ks[0]), "A1_b": cb(ks[1]),
        "A2_w": cw(ks[2]), "A2_b": cb(ks[3]),
        "Pi_w": cw(ks[4]), "Pi_b": cb(ks[5]),
        "R_w":  cw(ks[6]), "R_b":  cb(ks[7]),
        "bn_gamma": 1.0 + 0.1 * jax.random.normal(ks[8], (C,), jnp.float32),
        "bn_beta":  0.1 * jax.random.normal(ks[9], (C,), jnp.float32),
        "bn_mean":  0.1 * jax.random.normal(ks[10], (C,), jnp.float32),
        "bn_var":   1.0 + 0.1 * jnp.abs(jax.random.normal(ks[11], (C,), jnp.float32)),
    }


if __name__ == "__main__":
    B, C, H, W = 2, 4, 16, 16
    key = jax.random.PRNGKey(0)
    k_u, k_f, k_p = jax.random.split(key, 3)
    u = jax.random.normal(k_u, (B, C, H, W), jnp.float32)   # NCHW, like PyTorch
    f = jax.random.normal(k_f, (B, C, H, W), jnp.float32)
    params = make_params(k_p, C)

    u1, f_new = mg_restriction_forward(u, f, params)
    jax.block_until_ready((u1, f_new))

    u1_ref, f_ref = mg_restriction_ref(u, f, params)
    assert u1.shape == (B, C, H // 2, W // 2)
    assert f_new.shape == (B, C, H // 2, W // 2)
    # Kernel matmuls run at DEFAULT precision (bf16 MXU passes) against a
    # HIGHEST-precision reference, so the tolerance is loosened accordingly.
    assert jnp.allclose(u1, u1_ref, atol=5e-2, rtol=5e-2), \
        float(jnp.max(jnp.abs(u1 - u1_ref)))
    assert jnp.allclose(f_new, f_ref, atol=5e-2, rtol=5e-2), \
        float(jnp.max(jnp.abs(f_new - f_ref)))

    print("KERNEL_OK")
</pallas_src>

<mosaic_0001>
module attributes {stable_mosaic.version = 11 : i64} {
  func.func @_mg_restriction_kernel(%arg0: i32, %arg1: memref<1x9x64xf32, #tpu.memory_space<vmem>>, %arg2: memref<1x9x64xf32, #tpu.memory_space<vmem>>, %arg3: memref<1x8x64xf32, #tpu.memory_space<vmem>>, %arg4: memref<1x8x64xf32, #tpu.memory_space<vmem>>, %arg5: memref<3x64x64xf32, #tpu.memory_space<vmem>>, %arg6: memref<3x64x32xf32, #tpu.memory_space<vmem>>, %arg7: memref<3x64x32xf32, #tpu.memory_space<vmem>>, %arg8: memref<3x32x32xf32, #tpu.memory_space<vmem>>, %arg9: memref<1x64xf32, #tpu.memory_space<vmem>>, %arg10: memref<1x32xf32, #tpu.memory_space<vmem>>, %arg11: memref<1x32xf32, #tpu.memory_space<vmem>>, %arg12: memref<1x32xf32, #tpu.memory_space<vmem>>, %arg13: memref<1x32xf32, #tpu.memory_space<vmem>>, %arg14: memref<1x8x32xf32, #tpu.memory_space<vmem>>, %arg15: memref<1x8x32xf32, #tpu.memory_space<vmem>>) attributes {dimension_semantics = [#tpu.dimension_semantics<parallel>], iteration_bounds = array<i64: 2>, scalar_prefetch = 0 : i64, scratch_operands = 0 : i64, tpu.core_type = #tpu.core_type<tc>, window_params = [{transform_indices = @transform_0, window_bounds = array<i64: 1, 9, 64>}, {transform_indices = @transform_1, window_bounds = array<i64: 1, 9, 64>}, {transform_indices = @transform_2, window_bounds = array<i64: 1, 8, 64>}, {transform_indices = @transform_3, window_bounds = array<i64: 1, 8, 64>}, {pipeline_mode = #tpu.pipeline_mode<synchronous>, transform_indices = @transform_4, window_bounds = array<i64: 3, 64, 64>}, {pipeline_mode = #tpu.pipeline_mode<synchronous>, transform_indices = @transform_5, window_bounds = array<i64: 3, 64, 32>}, {pipeline_mode = #tpu.pipeline_mode<synchronous>, transform_indices = @transform_6, window_bounds = array<i64: 3, 64, 32>}, {pipeline_mode = #tpu.pipeline_mode<synchronous>, transform_indices = @transform_7, window_bounds = array<i64: 3, 32, 32>}, {pipeline_mode = #tpu.pipeline_mode<synchronous>, transform_indices = @transform_8, window_bounds = array<i64: 1, 64>}, {pipeline_mode = #tpu.pipeline_mode<synchronous>, transform_indices = @transform_9, window_bounds = array<i64: 1, 32>}, {pipeline_mode = #tpu.pipeline_mode<synchronous>, transform_indices = @transform_10, window_bounds = array<i64: 1, 32>}, {pipeline_mode = #tpu.pipeline_mode<synchronous>, transform_indices = @transform_11, window_bounds = array<i64: 1, 32>}, {pipeline_mode = #tpu.pipeline_mode<synchronous>, transform_indices = @transform_12, window_bounds = array<i64: 1, 32>}, {transform_indices = @transform_13, window_bounds = array<i64: 1, 8, 32>}, {transform_indices = @transform_14, window_bounds = array<i64: 1, 8, 32>}]} {
    %c0 = arith.constant 0 : index
    %c0_0 = arith.constant 0 : index
    %c0_1 = arith.constant 0 : index
    %0 = vector.load %arg1[%c0, %c0_0, %c0_1] : memref<1x9x64xf32, #tpu.memory_space<vmem>>, vector<1x9x64xf32>
    %1 = vector.shape_cast %0 : vector<1x9x64xf32> to vector<9x64xf32>
    %c0_2 = arith.constant 0 : index
    %c0_3 = arith.constant 0 : index
    %c0_4 = arith.constant 0 : index
    %2 = vector.load %arg2[%c0_2, %c0_3, %c0_4] : memref<1x9x64xf32, #tpu.memory_space<vmem>>, vector<1x9x64xf32>
    %3 = vector.shape_cast %2 : vector<1x9x64xf32> to vector<9x64xf32>
    %c0_5 = arith.constant 0 : index
    %c0_6 = arith.constant 0 : index
    %c0_7 = arith.constant 0 : index
    %4 = vector.load %arg3[%c0_5, %c0_6, %c0_7] : memref<1x8x64xf32, #tpu.memory_space<vmem>>, vector<1x8x64xf32>
    %5 = vector.shape_cast %4 : vector<1x8x64xf32> to vector<8x64xf32>
    %c0_8 = arith.constant 0 : index
    %c0_9 = arith.constant 0 : index
    %c0_10 = arith.constant 0 : index
    %6 = vector.load %arg4[%c0_8, %c0_9, %c0_10] : memref<1x8x64xf32, #tpu.memory_space<vmem>>, vector<1x8x64xf32>
    %7 = vector.shape_cast %6 : vector<1x8x64xf32> to vector<8x64xf32>
    %8 = vector.extract_strided_slice %1 {offsets = [0, 0], sizes = [8, 64], strides = [1, 1]} : vector<9x64xf32> to vector<8x64xf32>
    %9 = vector.extract_strided_slice %3 {offsets = [0, 0], sizes = [8, 64], strides = [1, 1]} : vector<9x64xf32> to vector<8x64xf32>
    %10 = vector.extract_strided_slice %1 {offsets = [1, 0], sizes = [8, 64], strides = [1, 1]} : vector<9x64xf32> to vector<8x64xf32>
    %11 = vector.extract_strided_slice %3 {offsets = [1, 0], sizes = [8, 64], strides = [1, 1]} : vector<9x64xf32> to vector<8x64xf32>
    %c0_11 = arith.constant 0 : index
    %c0_12 = arith.constant 0 : index
    %c0_13 = arith.constant 0 : index
    %12 = vector.load %arg5[%c0_11, %c0_12, %c0_13] : memref<3x64x64xf32, #tpu.memory_space<vmem>>, vector<1x64x64xf32>
    %13 = vector.shape_cast %12 : vector<1x64x64xf32> to vector<64x64xf32>
    %cst = arith.constant dense<0.000000e+00> : vector<8x64xf32>
    %14 = tpu.matmul %8, %13, %cst {dimension_numbers = #tpu.dot_dimension_numbers<[1], [0], [0], [1], [0, 0, 1, 1], [], []>} : vector<8x64xf32>, vector<64x64xf32>, vector<8x64xf32> -> vector<8x64xf32>
    %c1 = arith.constant 1 : index
    %c0_14 = arith.constant 0 : index
    %c0_15 = arith.constant 0 : index
    %15 = vector.load %arg5[%c1, %c0_14, %c0_15] : memref<3x64x64xf32, #tpu.memory_space<vmem>>, vector<1x64x64xf32>
    %16 = vector.shape_cast %15 : vector<1x64x64xf32> to vector<64x64xf32>
    %cst_16 = arith.constant dense<0.000000e+00> : vector<8x64xf32>
    %17 = tpu.matmul %9, %16, %cst_16 {dimension_numbers = #tpu.dot_dimension_numbers<[1], [0], [0], [1], [0, 0, 1, 1], [], []>} : vector<8x64xf32>, vector<64x64xf32>, vector<8x64xf32> -> vector<8x64xf32>
    %18 = arith.addf %14, %17 : vector<8x64xf32>
    %c2 = arith.constant 2 : index
    %c0_17 = arith.constant 0 : index
    %c0_18 = arith.constant 0 : index
    %19 = vector.load %arg5[%c2, %c0_17, %c0_18] : memref<3x64x64xf32, #tpu.memory_space<vmem>>, vector<1x64x64xf32>
    %20 = vector.shape_cast %19 : vector<1x64x64xf32> to vector<64x64xf32>
    %cst_19 = arith.constant dense<0.000000e+00> : vector<8x64xf32>
    %21 = tpu.matmul %10, %20, %cst_19 {dimension_numbers = #tpu.dot_dimension_numbers<[1], [0], [0], [1], [0, 0, 1, 1], [], []>} : vector<8x64xf32>, vector<64x64xf32>, vector<8x64xf32> -> vector<8x64xf32>
    %22 = arith.addf %18, %21 : vector<8x64xf32>
    %c0_20 = arith.constant 0 : index
    %c0_21 = arith.constant 0 : index
    %23 = vector.load %arg9[%c0_20, %c0_21] : memref<1x64xf32, #tpu.memory_space<vmem>>, vector<1x64xf32>
    %24 = vector.broadcast %23 : vector<1x64xf32> to vector<8x64xf32>
    %25 = arith.addf %22, %24 : vector<8x64xf32>
    %c0_22 = arith.constant 0 : index
    %c0_23 = arith.constant 0 : index
    %c0_24 = arith.constant 0 : index
    %26 = vector.load %arg5[%c0_22, %c0_23, %c0_24] : memref<3x64x64xf32, #tpu.memory_space<vmem>>, vector<1x64x64xf32>
    %27 = vector.shape_cast %26 : vector<1x64x64xf32> to vector<64x64xf32>
    %cst_25 = arith.constant dense<0.000000e+00> : vector<8x64xf32>
    %28 = tpu.matmul %9, %27, %cst_25 {dimension_numbers = #tpu.dot_dimension_numbers<[1], [0], [0], [1], [0, 0, 1, 1], [], []>} : vector<8x64xf32>, vector<64x64xf32>, vector<8x64xf32> -> vector<8x64xf32>
    %c1_26 = arith.constant 1 : index
    %c0_27 = arith.constant 0 : index
    %c0_28 = arith.constant 0 : index
    %29 = vector.load %arg5[%c1_26, %c0_27, %c0_28] : memref<3x64x64xf32, #tpu.memory_space<vmem>>, vector<1x64x64xf32>
    %30 = vector.shape_cast %29 : vector<1x64x64xf32> to vector<64x64xf32>
    %cst_29 = arith.constant dense<0.000000e+00> : vector<8x64xf32>
    %31 = tpu.matmul %10, %30, %cst_29 {dimension_numbers = #tpu.dot_dimension_numbers<[1], [0], [0], [1], [0, 0, 1, 1], [], []>} : vector<8x64xf32>, vector<64x64xf32>, vector<8x64xf32> -> vector<8x64xf32>
    %32 = arith.addf %28, %31 : vector<8x64xf32>
    %c2_30 = arith.constant 2 : index
    %c0_31 = arith.constant 0 : index
    %c0_32 = arith.constant 0 : index
    %33 = vector.load %arg5[%c2_30, %c0_31, %c0_32] : memref<3x64x64xf32, #tpu.memory_space<vmem>>, vector<1x64x64xf32>
    %34 = vector.shape_cast %33 : vector<1x64x64xf32> to vector<64x64xf32>
    %cst_33 = arith.constant dense<0.000000e+00> : vector<8x64xf32>
    %35 = tpu.matmul %11, %34, %cst_33 {dimension_numbers = #tpu.dot_dimension_numbers<[1], [0], [0], [1], [0, 0, 1, 1], [], []>} : vector<8x64xf32>, vector<64x64xf32>, vector<8x64xf32> -> vector<8x64xf32>
    %36 = arith.addf %32, %35 : vector<8x64xf32>
    %c0_34 = arith.constant 0 : index
    %c0_35 = arith.constant 0 : index
    %37 = vector.load %arg9[%c0_34, %c0_35] : memref<1x64xf32, #tpu.memory_space<vmem>>, vector<1x64xf32>
    %38 = vector.broadcast %37 : vector<1x64xf32> to vector<8x64xf32>
    %39 = arith.addf %36, %38 : vector<8x64xf32>
    %c0_36 = arith.constant 0 : index
    %c0_37 = arith.constant 0 : index
    %c0_38 = arith.constant 0 : index
    %40 = vector.load %arg6[%c0_36, %c0_37, %c0_38] : memref<3x64x32xf32, #tpu.memory_space<vmem>>, vector<1x64x32xf32>
    %41 = vector.shape_cast %40 : vector<1x64x32xf32> to vector<64x32xf32>
    %cst_39 = arith.constant dense<0.000000e+00> : vector<8x32xf32>
    %42 = tpu.matmul %8, %41, %cst_39 {dimension_numbers = #tpu.dot_dimension_numbers<[1], [0], [0], [1], [0, 0, 1, 1], [], []>} : vector<8x64xf32>, vector<64x32xf32>, vector<8x32xf32> -> vector<8x32xf32>
    %c1_40 = arith.constant 1 : index
    %c0_41 = arith.constant 0 : index
    %c0_42 = arith.constant 0 : index
    %43 = vector.load %arg6[%c1_40, %c0_41, %c0_42] : memref<3x64x32xf32, #tpu.memory_space<vmem>>, vector<1x64x32xf32>
    %44 = vector.shape_cast %43 : vector<1x64x32xf32> to vector<64x32xf32>
    %cst_43 = arith.constant dense<0.000000e+00> : vector<8x32xf32>
    %45 = tpu.matmul %9, %44, %cst_43 {dimension_numbers = #tpu.dot_dimension_numbers<[1], [0], [0], [1], [0, 0, 1, 1], [], []>} : vector<8x64xf32>, vector<64x32xf32>, vector<8x32xf32> -> vector<8x32xf32>
    %46 = arith.addf %42, %45 : vector<8x32xf32>
    %c2_44 = arith.constant 2 : index
    %c0_45 = arith.constant 0 : index
    %c0_46 = arith.constant 0 : index
    %47 = vector.load %arg6[%c2_44, %c0_45, %c0_46] : memref<3x64x32xf32, #tpu.memory_space<vmem>>, vector<1x64x32xf32>
    %48 = vector.shape_cast %47 : vector<1x64x32xf32> to vector<64x32xf32>
    %cst_47 = arith.constant dense<0.000000e+00> : vector<8x32xf32>
    %49 = tpu.matmul %10, %48, %cst_47 {dimension_numbers = #tpu.dot_dimension_numbers<[1], [0], [0], [1], [0, 0, 1, 1], [], []>} : vector<8x64xf32>, vector<64x32xf32>, vector<8x32xf32> -> vector<8x32xf32>
    %50 = arith.addf %46, %49 : vector<8x32xf32>
    %c0_48 = arith.constant 0 : index
    %c0_49 = arith.constant 0 : index
    %51 = vector.load %arg10[%c0_48, %c0_49] : memref<1x32xf32, #tpu.memory_space<vmem>>, vector<1x32xf32>
    %52 = vector.broadcast %51 : vector<1x32xf32> to vector<8x32xf32>
    %53 = arith.addf %50, %52 : vector<8x32xf32>
    %c0_50 = arith.constant 0 : index
    %c0_51 = arith.constant 0 : index
    %c0_52 = arith.constant 0 : index
    %54 = vector.load %arg14[%c0_50, %c0_51, %c0_52] : memref<1x8x32xf32, #tpu.memory_space<vmem>>, vector<1x8x32xf32>
    %55 = vector.shape_cast %54 : vector<1x8x32xf32> to vector<8x32xf32>
    %56 = vector.shape_cast %53 : vector<8x32xf32> to vector<1x8x32xf32>
    tpu.vector_store %arg14[%c0_50, %c0_51, %c0_52], %56 {strides = array<i32>} : memref<1x8x32xf32, #tpu.memory_space<vmem>>, vector<1x8x32xf32>,
    %57 = arith.subf %5, %25 : vector<8x64xf32>
    %58 = arith.subf %7, %39 : vector<8x64xf32>
    %cst_53 = arith.constant 0.000000e+00 : f32
    %59 = vector.broadcast %cst_53 : f32 to vector<1x64xf32>
    %60 = vector.extract_strided_slice %58 {offsets = [0, 0], sizes = [7, 64], strides = [1, 1]} : vector<8x64xf32> to vector<7x64xf32>
    %61 = tpu.concatenate %59, %60 in 0 : vector<1x64xf32>, vector<7x64xf32> -> vector<8x64xf32>
    %c0_54 = arith.constant 0 : index
    %c0_55 = arith.constant 0 : index
    %c0_56 = arith.constant 0 : index
    %62 = vector.load %arg7[%c0_54, %c0_55, %c0_56] : memref<3x64x32xf32, #tpu.memory_space<vmem>>, vector<1x64x32xf32>
    %63 = vector.shape_cast %62 : vector<1x64x32xf32> to vector<64x32xf32>
    %cst_57 = arith.constant dense<0.000000e+00> : vector<8x32xf32>
    %64 = tpu.matmul %61, %63, %cst_57 {dimension_numbers = #tpu.dot_dimension_numbers<[1], [0], [0], [1], [0, 0, 1, 1], [], []>} : vector<8x64xf32>, vector<64x32xf32>, vector<8x32xf32> -> vector<8x32xf32>
    %c1_58 = arith.constant 1 : index
    %c0_59 = arith.constant 0 : index
    %c0_60 = arith.constant 0 : index
    %65 = vector.load %arg7[%c1_58, %c0_59, %c0_60] : memref<3x64x32xf32, #tpu.memory_space<vmem>>, vector<1x64x32xf32>
    %66 = vector.shape_cast %65 : vector<1x64x32xf32> to vector<64x32xf32>
    %cst_61 = arith.constant dense<0.000000e+00> : vector<8x32xf32>
    %67 = tpu.matmul %57, %66, %cst_61 {dimension_numbers = #tpu.dot_dimension_numbers<[1], [0], [0], [1], [0, 0, 1, 1], [], []>} : vector<8x64xf32>, vector<64x32xf32>, vector<8x32xf32> -> vector<8x32xf32>
    %68 = arith.addf %64, %67 : vector<8x32xf32>
    %c2_62 = arith.constant 2 : index
    %c0_63 = arith.constant 0 : index
    %c0_64 = arith.constant 0 : index
    %69 = vector.load %arg7[%c2_62, %c0_63, %c0_64] : memref<3x64x32xf32, #tpu.memory_space<vmem>>, vector<1x64x32xf32>
    %70 = vector.shape_cast %69 : vector<1x64x32xf32> to vector<64x32xf32>
    %cst_65 = arith.constant dense<0.000000e+00> : vector<8x32xf32>
    %71 = tpu.matmul %58, %70, %cst_65 {dimension_numbers = #tpu.dot_dimension_numbers<[1], [0], [0], [1], [0, 0, 1, 1], [], []>} : vector<8x64xf32>, vector<64x32xf32>, vector<8x32xf32> -> vector<8x32xf32>
    %72 = arith.addf %68, %71 : vector<8x32xf32>
    %c0_66 = arith.constant 0 : index
    %c0_67 = arith.constant 0 : index
    %73 = vector.load %arg12[%c0_66, %c0_67] : memref<1x32xf32, #tpu.memory_space<vmem>>, vector<1x32xf32>
    %74 = vector.broadcast %73 : vector<1x32xf32> to vector<8x32xf32>
    %75 = arith.mulf %72, %74 : vector<8x32xf32>
    %c0_68 = arith.constant 0 : index
    %c0_69 = arith.constant 0 : index
    %76 = vector.load %arg13[%c0_68, %c0_69] : memref<1x32xf32, #tpu.memory_space<vmem>>, vector<1x32xf32>
    %77 = vector.broadcast %76 : vector<1x32xf32> to vector<8x32xf32>
    %78 = arith.addf %75, %77 : vector<8x32xf32>
    %cst_70 = arith.constant 0.000000e+00 : f32
    %79 = vector.broadcast %cst_70 : f32 to vector<8x32xf32>
    %80 = arith.maximumf %78, %79 : vector<8x32xf32>
    %cst_71 = arith.constant 0.000000e+00 : f32
    %81 = vector.broadcast %cst_71 : f32 to vector<1x32xf32>
    %82 = vector.extract_strided_slice %53 {offsets = [0, 0], sizes = [7, 32], strides = [1, 1]} : vector<8x32xf32> to vector<7x32xf32>
    %83 = tpu.concatenate %81, %82 in 0 : vector<1x32xf32>, vector<7x32xf32> -> vector<8x32xf32>
    %c0_72 = arith.constant 0 : index
    %c0_73 = arith.constant 0 : index
    %c0_74 = arith.constant 0 : index
    %84 = vector.load %arg8[%c0_72, %c0_73, %c0_74] : memref<3x32x32xf32, #tpu.memory_space<vmem>>, vector<1x32x32xf32>
    %85 = vector.shape_cast %84 : vector<1x32x32xf32> to vector<32x32xf32>
    %cst_75 = arith.constant dense<0.000000e+00> : vector<8x32xf32>
    %86 = tpu.matmul %83, %85, %cst_75 {dimension_numbers = #tpu.dot_dimension_numbers<[1], [0], [0], [1], [0, 0, 1, 1], [], []>} : vector<8x32xf32>, vector<32x32xf32>, vector<8x32xf32> -> vector<8x32xf32>
    %c1_76 = arith.constant 1 : index
    %c0_77 = arith.constant 0 : index
    %c0_78 = arith.constant 0 : index
    %87 = vector.load %arg8[%c1_76, %c0_77, %c0_78] : memref<3x32x32xf32, #tpu.memory_space<vmem>>, vector<1x32x32xf32>
    %88 = vector.shape_cast %87 : vector<1x32x32xf32> to vector<32x32xf32>
    %cst_79 = arith.constant dense<0.000000e+00> : vector<8x32xf32>
    %89 = tpu.matmul %53, %88, %cst_79 {dimension_numbers = #tpu.dot_dimension_numbers<[1], [0], [0], [1], [0, 0, 1, 1], [], []>} : vector<8x32xf32>, vector<32x32xf32>, vector<8x32xf32> -> vector<8x32xf32>
    %90 = arith.addf %86, %89 : vector<8x32xf32>
    %cst_80 = arith.constant 0.000000e+00 : f32
    %91 = vector.broadcast %cst_80 : f32 to vector<1x32xf32>
    %92 = vector.extract_strided_slice %53 {offsets = [1, 0], sizes = [7, 32], strides = [1, 1]} : vector<8x32xf32> to vector<7x32xf32>
    %93 = tpu.concatenate %92, %91 in 0 : vector<7x32xf32>, vector<1x32xf32> -> vector<8x32xf32>
    %c2_81 = arith.constant 2 : index
    %c0_82 = arith.constant 0 : index
    %c0_83 = arith.constant 0 : index
    %94 = vector.load %arg8[%c2_81, %c0_82, %c0_83] : memref<3x32x32xf32, #tpu.memory_space<vmem>>, vector<1x32x32xf32>
    %95 = vector.shape_cast %94 : vector<1x32x32xf32> to vector<32x32xf32>
    %cst_84 = arith.constant dense<0.000000e+00> : vector<8x32xf32>
    %96 = tpu.matmul %93, %95, %cst_84 {dimension_numbers = #tpu.dot_dimension_numbers<[1], [0], [0], [1], [0, 0, 1, 1], [], []>} : vector<8x32xf32>, vector<32x32xf32>, vector<8x32xf32> -> vector<8x32xf32>
    %97 = arith.addf %90, %96 : vector<8x32xf32>
    %c0_85 = arith.constant 0 : index
    %c0_86 = arith.constant 0 : index
    %98 = vector.load %arg11[%c0_85, %c0_86] : memref<1x32xf32, #tpu.memory_space<vmem>>, vector<1x32xf32>
    %99 = vector.broadcast %98 : vector<1x32xf32> to vector<8x32xf32>
    %100 = arith.addf %97, %99 : vector<8x32xf32>
    %101 = arith.addf %80, %100 : vector<8x32xf32>
    %c0_87 = arith.constant 0 : index
    %c0_88 = arith.constant 0 : index
    %c0_89 = arith.constant 0 : index
    %102 = vector.load %arg15[%c0_87, %c0_88, %c0_89] : memref<1x8x32xf32, #tpu.memory_space<vmem>>, vector<1x8x32xf32>
    %103 = vector.shape_cast %102 : vector<1x8x32xf32> to vector<8x32xf32>
    %104 = vector.shape_cast %101 : vector<8x32xf32> to vector<1x8x32xf32>
    tpu.vector_store %arg15[%c0_87, %c0_88, %c0_89], %104 {strides = array<i32>} : memref<1x8x32xf32, #tpu.memory_space<vmem>>, vector<1x8x32xf32>,
    return
  }
  func.func @transform_0(%arg0: i32) -> (i32, i32, i32) {
    %c0_i32 = arith.constant 0 : i32
    %c0_i32_0 = arith.constant 0 : i32
    %c0_i32_1 = arith.constant 0 : i32
    return %arg0, %c0_i32, %c0_i32_0 : i32, i32, i32
  }
  func.func @transform_1(%arg0: i32) -> (i32, i32, i32) {
    %c0_i32 = arith.constant 0 : i32
    %c0_i32_0 = arith.constant 0 : i32
    %c0_i32_1 = arith.constant 0 : i32
    return %arg0, %c0_i32, %c0_i32_0 : i32, i32, i32
  }
  func.func @transform_2(%arg0: i32) -> (i32, i32, i32) {
    %c0_i32 = arith.constant 0 : i32
    %c0_i32_0 = arith.constant 0 : i32
    %c0_i32_1 = arith.constant 0 : i32
    return %arg0, %c0_i32, %c0_i32_0 : i32, i32, i32
  }
  func.func @transform_3(%arg0: i32) -> (i32, i32, i32) {
    %c0_i32 = arith.constant 0 : i32
    %c0_i32_0 = arith.constant 0 : i32
    %c0_i32_1 = arith.constant 0 : i32
    return %arg0, %c0_i32, %c0_i32_0 : i32, i32, i32
  }
  func.func @transform_4(%arg0: i32) -> (i32, i32, i32) {
    %c0_i32 = arith.constant 0 : i32
    %c0_i32_0 = arith.constant 0 : i32
    %c0_i32_1 = arith.constant 0 : i32
    %c0_i32_2 = arith.constant 0 : i32
    return %c0_i32, %c0_i32_0, %c0_i32_1 : i32, i32, i32
  }
  func.func @transform_5(%arg0: i32) -> (i32, i32, i32) {
    %c0_i32 = arith.constant 0 : i32
    %c0_i32_0 = arith.constant 0 : i32
    %c0_i32_1 = arith.constant 0 : i32
    %c0_i32_2 = arith.constant 0 : i32
    return %c0_i32, %c0_i32_0, %c0_i32_1 : i32, i32, i32
  }
  func.func @transform_6(%arg0: i32) -> (i32, i32, i32) {
    %c0_i32 = arith.constant 0 : i32
    %c0_i32_0 = arith.constant 0 : i32
    %c0_i32_1 = arith.constant 0 : i32
    %c0_i32_2 = arith.constant 0 : i32
    return %c0_i32, %c0_i32_0, %c0_i32_1 : i32, i32, i32
  }
  func.func @transform_7(%arg0: i32) -> (i32, i32, i32) {
    %c0_i32 = arith.constant 0 : i32
    %c0_i32_0 = arith.constant 0 : i32
    %c0_i32_1 = arith.constant 0 : i32
    %c0_i32_2 = arith.constant 0 : i32
    return %c0_i32, %c0_i32_0, %c0_i32_1 : i32, i32, i32
  }
  func.func @transform_8(%arg0: i32) -> (i32, i32) {
    %c0_i32 = arith.constant 0 : i32
    %c0_i32_0 = arith.constant 0 : i32
    %c0_i32_1 = arith.constant 0 : i32
    return %c0_i32, %c0_i32_0 : i32, i32
  }
  func.func @transform_9(%arg0: i32) -> (i32, i32) {
    %c0_i32 = arith.constant 0 : i32
    %c0_i32_0 = arith.constant 0 : i32
    %c0_i32_1 = arith.constant 0 : i32
    return %c0_i32, %c0_i32_0 : i32, i32
  }
  func.func @transform_10(%arg0: i32) -> (i32, i32) {
    %c0_i32 = arith.constant 0 : i32
    %c0_i32_0 = arith.constant 0 : i32
    %c0_i32_1 = arith.constant 0 : i32
    return %c0_i32, %c0_i32_0 : i32, i32
  }
  func.func @transform_11(%arg0: i32) -> (i32, i32) {
    %c0_i32 = arith.constant 0 : i32
    %c0_i32_0 = arith.constant 0 : i32
    %c0_i32_1 = arith.constant 0 : i32
    return %c0_i32, %c0_i32_0 : i32, i32
  }
  func.func @transform_12(%arg0: i32) -> (i32, i32) {
    %c0_i32 = arith.constant 0 : i32
    %c0_i32_0 = arith.constant 0 : i32
    %c0_i32_1 = arith.constant 0 : i32
    return %c0_i32, %c0_i32_0 : i32, i32
  }
  func.func @transform_13(%arg0: i32) -> (i32, i32, i32) {
    %c0_i32 = arith.constant 0 : i32
    %c0_i32_0 = arith.constant 0 : i32
    %c0_i32_1 = arith.constant 0 : i32
    return %arg0, %c0_i32, %c0_i32_0 : i32, i32, i32
  }
  func.func @transform_14(%arg0: i32) -> (i32, i32, i32) {
    %c0_i32 = arith.constant 0 : i32
    %c0_i32_0 = arith.constant 0 : i32
    %c0_i32_1 = arith.constant 0 : i32
    return %arg0, %c0_i32, %c0_i32_0 : i32, i32, i32
  }
}

</mosaic_0001>

<bundles_post_ra>
// kernel: tile.28
= control target key start
LH: loop header
LB: loop body
LE: loop exit
PB: predicated region body
PF: predicated region fallthrough
CT: control target
= control target key end

     0   :  { %s28_s0 = inlined_call_operand.vmem [shape: f32[4], index: 0, kind: input, shape index: {}]   ;;  %s29_s1 = inlined_call_operand.vmem [shape: f32[16,4], index: 1, kind: output, shape index: {}]  }
   0x1   :  { %v4_v0 = vld [vmem:[%s28_s0] ss:$0 sm:$0xff] }
   0x2   :  { %5 = vst [vmem:[%s29_s1] sm:$0xff] %v4_v0  ;;  %8 = vst [vmem:[%s29_s1 + $0x8] sm:$0xff] %v4_v0 }

// kernel: tile.29
= control target key start
LH: loop header
LB: loop body
LE: loop exit
PB: predicated region body
PF: predicated region fallthrough
CT: control target
= control target key end

     0   :  { %s131_s10 = smov 60   ;;  %s132_s11 = smov 52   ;;  %vm3_vm0 = vcmask 31744   ;;  %vm9_vm1 = vcmask 523744   ;;  %vm15_vm2 = vcmask 490944   ;;  %vm21_vm3 = vcmask 458144   ;;  %s207_s0 = inlined_call_operand.vmem [shape: f32[16,4], index: 0, kind: input, shape index: {}]   ;;  %s208_s1 = inlined_call_operand.vmem [shape: f32[1,64], index: 1, kind: output, shape index: {}]  }
   0x1   :  { %v101_v0 = vld [vmem:[%s207_s0 + $0xf] sm:$0x1]   ;;  %v103_v1 = vld [vmem:[%s207_s0 + $0xd] sm:$0x1]   ;;  %v102_v2 = vld [vmem:[%s207_s0 + $0xe] sm:$0x1]  }
   0x2   :  { %7 = vrot.lane.b32.xlu0 %v101_v0, %s131_s10  ;;  %19 = vrot.lane.b32.xlu1 %v103_v1, %s132_s11  ;;  %v104_v3 = vld [vmem:[%s207_s0 + $0xc] sm:$0x1]   ;;  %s133_s16 = smov 56   ;;  %s134_s17 = smov 48   ;;  %v105_v4 = vld [vmem:[%s207_s0 + $0xb] sm:$0x1]  }
   0x3   :  { %v106_v5 = vld [vmem:[%s207_s0 + $0xa] sm:$0x1]   ;;  %v2_v6 = vld [vmem:[%s207_s0] sm:$0x1]   ;;  %s135_s24 = smov 44   ;;  %s136_s25 = smov 40  }
   0x4   :  { %4 = vst.msk [vmem:[#allocation0] sm:$0x1] %vm3_vm0, %v2_v6   ;;  %v107_v7 = vld [vmem:[%s207_s0 + $0x9] sm:$0x1]   ;;  %v108_v8 = vld [vmem:[%s207_s0 + $0x8] sm:$0x1]  }
   0x5   :  { %s137_s30 = smov 36   ;;  %s138_s2 = smov 32   ;;  %v109_v9 = vld [vmem:[%s207_s0 + $0x7] sm:$0x1]   ;;  %v110_v10 = vld [vmem:[%s207_s0 + $0x6] sm:$0x1]  }
   0x6   :  { %13 = vrot.lane.b32.xlu0 %v102_v2, %s133_s16  ;;  %25 = vrot.lane.b32.xlu1 %v104_v3, %s134_s17  ;;  %s139_s7 = smov 28   ;;  %s140_s8 = smov 24   ;;  %v111_v11 = vld [vmem:[%s207_s0 + $0x5] sm:$0x1]   ;;  %v112_v12 = vld [vmem:[%s207_s0 + $0x4] sm:$0x1]  }
   0x7   :  { %s141_s13 = smov 20   ;;  %s142_s14 = smov 16   ;;  %v113_v13 = vld [vmem:[%s207_s0 + $0x3] sm:$0x1]   ;;  %v114_v14 = vld [vmem:[%s207_s0 + $0x2] sm:$0x1]  }
   0x8   :  { %s143_s19 = smov 12   ;;  %s144_s20 = smov 8   ;;  %v115_v15 = vld [vmem:[%s207_s0 + $0x1] sm:$0x1]   ;;  %vm27_vm4 = vcmask 425344   ;;  %vm33_vm5 = vcmask 392544  }
   0x9   :  { %s145_s0 = smov 4   ;;  %vm39_vm6 = vcmask 359744   ;;  %vm45_vm7 = vcmask 326944   ;;  %vm51_vm8 = vcmask 294144   ;;  %vm57_vm9 = vcmask 261344  }
   0xa   :  { %31 = vrot.lane.b32.xlu0 %v105_v4, %s135_s24  ;;  %37 = vrot.lane.b32.xlu1 %v106_v5, %s136_s25  ;;  %vm63_vm10 = vcmask 228544   ;;  %vm69_vm11 = vcmask 195744   ;;  %vm75_vm12 = vcmask 162944   ;;  %vm81_vm13 = vcmask 130144  }
   0xb   :  { %vm87_vm14 = vcmask 97344   ;;  %vm93_vm15 = vcmask 64544  }
   0xe   :  { %43 = vrot.lane.b32.xlu0 %v107_v7, %s137_s30  ;;  %49 = vrot.lane.b32.xlu1 %v108_v8, %s138_s2 }
  0x12   :  { %55 = vrot.lane.b32.xlu0 %v109_v9, %s139_s7  ;;  %61 = vrot.lane.b32.xlu1 %v110_v10, %s140_s8 }
  0x16   :  { %67 = vrot.lane.b32.xlu0 %v111_v11, %s141_s13  ;;  %73 = vrot.lane.b32.xlu1 %v112_v12, %s142_s14 }
  0x1a   :  { %79 = vrot.lane.b32.xlu0 %v113_v13, %s143_s19  ;;  %85 = vrot.lane.b32.xlu1 %v114_v14, %s144_s20 }
  0x1e   :  { %91 = vrot.lane.b32.xlu0 %v115_v15, %s145_s0 }
  0x74   :  { %v8_v16 = vpop.permute.xlu0 %7   ;;  %v20_v17 = vpop.permute.xlu1 %19  }
  0x75   :  { %10 = vst.msk [vmem:[#allocation0] sm:$0x1] %vm9_vm1, %v8_v16  }
  0x78   :  { %v14_v18 = vpop.permute.xlu0 %13   ;;  %v26_v19 = vpop.permute.xlu1 %25  }
  0x79   :  { %16 = vst.msk [vmem:[#allocation0] sm:$0x1] %vm15_vm2, %v14_v18  }
  0x7a   :  { %22 = vst.msk [vmem:[#allocation0] sm:$0x1] %vm21_vm3, %v20_v17  }
  0x7b   :  { %28 = vst.msk [vmem:[#allocation0] sm:$0x1] %vm27_vm4, %v26_v19  }
  0x7c   :  { %v32_v20 = vpop.permute.xlu0 %31   ;;  %v38_v21 = vpop.permute.xlu1 %37  }
  0x7d   :  { %34 = vst.msk [vmem:[#allocation0] sm:$0x1] %vm33_vm5, %v32_v20  }
  0x7e   :  { %40 = vst.msk [vmem:[#allocation0] sm:$0x1] %vm39_vm6, %v38_v21  }
  0x80   :  { %v44_v22 = vpop.permute.xlu0 %43   ;;  %v50_v23 = vpop.permute.xlu1 %49  }
  0x81   :  { %46 = vst.msk [vmem:[#allocation0] sm:$0x1] %vm45_vm7, %v44_v22  }
  0x82   :  { %52 = vst.msk [vmem:[#allocation0] sm:$0x1] %vm51_vm8, %v50_v23  }
  0x84   :  { %v56_v24 = vpop.permute.xlu0 %55   ;;  %v62_v25 = vpop.permute.xlu1 %61  }
  0x85   :  { %58 = vst.msk [vmem:[#allocation0] sm:$0x1] %vm57_vm9, %v56_v24  }
  0x86   :  { %64 = vst.msk [vmem:[#allocation0] sm:$0x1] %vm63_vm10, %v62_v25  }
  0x88   :  { %v68_v26 = vpop.permute.xlu0 %67   ;;  %v74_v27 = vpop.permute.xlu1 %73  }
  0x89   :  { %70 = vst.msk [vmem:[#allocation0] sm:$0x1] %vm69_vm11, %v68_v26  }
  0x8a   :  { %76 = vst.msk [vmem:[#allocation0] sm:$0x1] %vm75_vm12, %v74_v27  }
  0x8c   :  { %v80_v28 = vpop.permute.xlu0 %79   ;;  %v86_v29 = vpop.permute.xlu1 %85  }
  0x8d   :  { %82 = vst.msk [vmem:[#allocation0] sm:$0x1] %vm81_vm13, %v80_v28  }
  0x8e   :  { %88 = vst.msk [vmem:[#allocation0] sm:$0x1] %vm87_vm14, %v86_v29  }
  0x90   :  { %v92_v30 = vpop.permute.xlu0 %91  }
  0x91   :  { %94 = vst.msk [vmem:[#allocation0] sm:$0x1] %vm93_vm15, %v92_v30  }
  0x98   :  { %v98_v31 = vld [vmem:[#allocation0] sm:$0x1] }
  0x99   :  { %100 = vst [vmem:[%s208_s1] sm:$0x1] %v98_v31 }

// kernel: tile.33
= control target key start
LH: loop header
LB: loop body
LE: loop exit
PB: predicated region body
PF: predicated region fallthrough
CT: control target
= control target key end

     0   :  { %s22_s0 = inlined_call_operand.vmem [shape: f32[4], index: 0, kind: input, shape index: {}]   ;;  %s23_s1 = inlined_call_operand.vmem [shape: f32[8,4], index: 1, kind: output, shape index: {}]  }
   0x1   :  { %v4_v0 = vld [vmem:[%s22_s0] ss:$0 sm:$0xff] }
   0x2   :  { %5 = vst [vmem:[%s23_s1] sm:$0xff] %v4_v0 }

// kernel: tile.34
= control target key start
LH: loop header
LB: loop body
LE: loop exit
PB: predicated region body
PF: predicated region fallthrough
CT: control target
= control target key end

     0   :  { %s67_s10 = smov 28   ;;  %s68_s11 = smov 20   ;;  %vm3_vm0 = vcmask 31744   ;;  %vm9_vm1 = vcmask 261344   ;;  %vm15_vm2 = vcmask 228544   ;;  %vm21_vm3 = vcmask 195744   ;;  %s111_s0 = inlined_call_operand.vmem [shape: f32[8,4], index: 0, kind: input, shape index: {}]   ;;  %s112_s1 = inlined_call_operand.vmem [shape: f32[1,32], index: 1, kind: output, shape index: {}]  }
   0x1   :  { %v53_v0 = vld [vmem:[%s111_s0 + $0x7] sm:$0x1]   ;;  %v55_v1 = vld [vmem:[%s111_s0 + $0x5] sm:$0x1]   ;;  %v54_v2 = vld [vmem:[%s111_s0 + $0x6] sm:$0x1]  }
   0x2   :  { %7 = vrot.lane.b32.xlu0 %v53_v0, %s67_s10  ;;  %19 = vrot.lane.b32.xlu1 %v55_v1, %s68_s11  ;;  %v56_v3 = vld [vmem:[%s111_s0 + $0x4] sm:$0x1]   ;;  %v2_v4 = vld [vmem:[%s111_s0] sm:$0x1]   ;;  %s69_s18 = smov 24   ;;  %s70_s19 = smov 16  }
   0x3   :  { %4 = vst.msk [vmem:[#allocation0] sm:$0x1] %vm3_vm0, %v2_v4   ;;  %v57_v5 = vld [vmem:[%s111_s0 + $0x3] sm:$0x1]   ;;  %v58_v6 = vld [vmem:[%s111_s0 + $0x2] sm:$0x1]  }
   0x4   :  { %s71_s24 = smov 12   ;;  %s72_s25 = smov 8   ;;  %v59_v7 = vld [vmem:[%s111_s0 + $0x1] sm:$0x1]   ;;  %vm27_vm4 = vcmask 162944   ;;  %vm33_vm5 = vcmask 130144  }
   0x5   :  { %s73_s0 = smov 4   ;;  %vm39_vm6 = vcmask 97344   ;;  %vm45_vm7 = vcmask 64544  }
   0x6   :  { %13 = vrot.lane.b32.xlu0 %v54_v2, %s69_s18  ;;  %25 = vrot.lane.b32.xlu1 %v56_v3, %s70_s19 }
   0xa   :  { %31 = vrot.lane.b32.xlu0 %v57_v5, %s71_s24  ;;  %37 = vrot.lane.b32.xlu1 %v58_v6, %s72_s25 }
   0xe   :  { %43 = vrot.lane.b32.xlu0 %v59_v7, %s73_s0 }
  0x74   :  { %v8_v8 = vpop.permute.xlu0 %7   ;;  %v20_v9 = vpop.permute.xlu1 %19  }
  0x75   :  { %10 = vst.msk [vmem:[#allocation0] sm:$0x1] %vm9_vm1, %v8_v8  }
  0x78   :  { %v14_v10 = vpop.permute.xlu0 %13   ;;  %v26_v11 = vpop.permute.xlu1 %25  }
  0x79   :  { %16 = vst.msk [vmem:[#allocation0] sm:$0x1] %vm15_vm2, %v14_v10  }
  0x7a   :  { %22 = vst.msk [vmem:[#allocation0] sm:$0x1] %vm21_vm3, %v20_v9  }
  0x7b   :  { %28 = vst.msk [vmem:[#allocation0] sm:$0x1] %vm27_vm4, %v26_v11  }
  0x7c   :  { %v32_v12 = vpop.permute.xlu0 %31   ;;  %v38_v13 = vpop.permute.xlu1 %37  }
  0x7d   :  { %34 = vst.msk [vmem:[#allocation0] sm:$0x1] %vm33_vm5, %v32_v12  }
  0x7e   :  { %40 = vst.msk [vmem:[#allocation0] sm:$0x1] %vm39_vm6, %v38_v13  }
  0x80   :  { %v44_v14 = vpop.permute.xlu0 %43  }
  0x81   :  { %46 = vst.msk [vmem:[#allocation0] sm:$0x1] %vm45_vm7, %v44_v14  }
  0x88   :  { %v50_v15 = vld [vmem:[#allocation0] sm:$0x1] }
  0x89   :  { %52 = vst [vmem:[%s112_s1] sm:$0x1] %v50_v15 }

// kernel: mg_restriction_forward.1
= control target key start
LH: loop header
LB: loop body
LE: loop exit
PB: predicated region body
PF: predicated region fallthrough
CT: control target
= control target key end

     0   :  { %s2640_s29 = smov 0   ;;  %s3098_s0 = inlined_call_operand.vmem [shape: f32[2,9,64], index: 0, kind: input, shape index: {}]   ;;  %s3099_s1 = inlined_call_operand.vmem [shape: f32[2,9,64], index: 1, kind: input, shape index: {}]   ;;  %s3100_s2 = inlined_call_operand.vmem [shape: f32[2,8,64], index: 2, kind: input, shape index: {}]   ;;  %s3101_s3 = inlined_call_operand.vmem [shape: f32[2,8,64], index: 3, kind: input, shape index: {}]   ;;  %s3102_s4 = inlined_call_operand.vmem [shape: f32[3,64,64], index: 4, kind: input, shape index: {}]   ;;  %s3103_s5 = inlined_call_operand.vmem [shape: f32[3,64,32], index: 5, kind: input, shape index: {}]   ;;  %s3104_s6 = inlined_call_operand.vmem [shape: f32[3,64,32], index: 6, kind: input, shape index: {}]   ;;  %s3105_s7 = inlined_call_operand.vmem [shape: f32[3,32,32], index: 7, kind: input, shape index: {}]   ;;  %s3106_s8 = inlined_call_operand.vmem [shape: f32[1,64], index: 8, kind: input, shape index: {}]   ;;  %s3107_s9 = inlined_call_operand.vmem [shape: f32[1,32], index: 9, kind: input, shape index: {}]   ;;  %s3108_s10 = inlined_call_operand.vmem [shape: f32[1,32], index: 10, kind: input, shape index: {}]   ;;  %s3109_s11 = inlined_call_operand.vmem [shape: f32[1,32], index: 11, kind: input, shape index: {}]   ;;  %s3110_s12 = inlined_call_operand.vmem [shape: f32[1,32], index: 12, kind: input, shape index: {}]   ;;  %s3111_s13 = inlined_call_operand.vmem [shape: f32[2,8,32], index: 13, kind: output, shape index: {0}]   ;;  %s3112_s14 = inlined_call_operand.vmem [shape: f32[2,8,32], index: 14, kind: output, shape index: {1}]  }
   0x1 LB: > { %s1900_s30 = sadd.s32 4294967295, %s2560_s29   ;;  %p1904_p0 = scmp.ge.s32.totalorder %s2560_s29, 1  ;;  %s2560_s29 = sphi %s2640_s29, %s25_s29  }
   0x2   : > { %p443_p1 = scmp.lt.s32.totalorder %s2560_s29, 3 }
   0x4   : > { %p444_p2 = pnand %p1904_p0, %p443_p1 }
   0x5   : > { %v1913_v0 = vld [vmem:[%s3102_s4 + $0x40] sm:$0xff] (!%p444_p2)  ;;  %v1914_v1 = vld [vmem:[%s3102_s4 + $0x48] sm:$0xff] (!%p444_p2)  ;;  %v2562_v3 = vmov (!%p444_p2), 0.0|0.0   ;;  %v1915_v6 = vld [vmem:[%s3102_s4 + $0x50] sm:$0xff] (!%p444_p2)  ;;  %p2670_p3 = scmp.lt.s32.totalorder (!%p444_p2), %s1900_s30, 1  ;;  %vm2563_vm0 = vmmov (!%p444_p2), 0  }
   0x6   : > { %447 = sbr.rel (%p444_p2) target bundleno = 538 (0x21a), region = 72  ;;  %v537_v2 = vld [vmem:[%s3102_s4] sm:$0xff] (!%p444_p2)  ;;  %2377 = vmatprep.subr.bf16.mxu0 (!%p444_p2), %v2562_v3  ;;  %v2378_v4 = vpack.c.bf16 (!%p444_p2), %v1914_v1, %v1913_v0  ;;  %2389 = vmatprep.subr.bf16.mxu1 (!%p444_p2), %v2562_v3  ;;  %v538_v5 = vld [vmem:[%s3102_s4 + $0x8] sm:$0xff] (!%p444_p2)  ;;  %v1916_v7 = vld [vmem:[%s3102_s4 + $0x58] sm:$0xff] (!%p444_p2)  ;;  %v2564_v11 = vmov (!%p444_p2), 0.0   ;;  %vm554_vm1 = vcmask (!%p444_p2), 523264  }
   0x7   : > { %v2674_v8 = vpack.c.bf16 (!%p444_p2), %v538_v5, %v537_v2  ;;  %v539_v9 = vld [vmem:[%s3102_s4 + $0x10] sm:$0xff] (!%p444_p2)  ;;  %v540_v10 = vld [vmem:[%s3102_s4 + $0x18] sm:$0xff] (!%p444_p2)  ;;  %2132 = vmatprep.mubr.msk.f32.mxu0 (!%p444_p2), %vm2563_vm0, %v2564_v11  ;;  %2151 = vmatprep.mubr.msk.f32.mxu1 (!%p444_p2), %vm2563_vm0, %v2564_v11  ;;  %v2381_v12 = vpack.c.bf16 (!%p444_p2), %v1916_v7, %v1915_v6  ;;  %v1917_v14 = vld [vmem:[%s3102_s4 + $0x60] sm:$0xff] (!%p444_p2)  ;;  %vm711_vm2 = vcmask (!%p444_p2), 1046528   ;;  %vm1266_vm3 = vcmask (!%p444_p2), 1040384  }
   0x8   : > { %2379 = vmatpush3.bf16.msra.mxu0 (!%p444_p2), %v2378_v4  ;;  %v2688_v13 = vpack.c.bf16 (!%p444_p2), %v540_v10, %v539_v9  ;;  %v1918_v15 = vld [vmem:[%s3102_s4 + $0x68] sm:$0xff] (!%p444_p2)  ;;  %v541_v16 = vld [vmem:[%s3102_s4 + $0x20] sm:$0xff] (!%p444_p2)  ;;  %v1919_v20 = vld [vmem:[%s3102_s4 + $0x70] sm:$0xff] (!%p444_p2)  ;;  %vm1259_vm4 = vcmask (!%p444_p2), 261120  }
   0x9   : > { %2391 = vmatpush3.bf16.msra.mxu1 (!%p444_p2), %v2674_v8  ;;  %2380 = vmatprep.subr.bf16.mxu0 (!%p444_p2), %v2562_v3  ;;  %v542_v17 = vld [vmem:[%s3102_s4 + $0x28] sm:$0xff] (!%p444_p2)  ;;  %v2384_v18 = vpack.c.bf16 (!%p444_p2), %v1918_v15, %v1917_v14  ;;  %v1920_v21 = vld [vmem:[%s3102_s4 + $0x78] sm:$0xff] (!%p444_p2)  ;;  %v543_v22 = vld [vmem:[%s3102_s4 + $0x30] sm:$0xff] (!%p444_p2) }
   0xa   : > { %2392 = vmatprep.subr.bf16.mxu1 (!%p444_p2), %v2562_v3  ;;  %v2711_v19 = vpack.c.bf16 (!%p444_p2), %v542_v17, %v541_v16  ;;  %v544_v23 = vld [vmem:[%s3102_s4 + $0x38] sm:$0xff] (!%p444_p2)  ;;  %v2387_v24 = vpack.c.bf16 (!%p444_p2), %v1920_v21, %v1919_v20  ;;  %v1923_v26 = vld [vmem:[%s3102_s4 + $0x80] sm:$0xff] (!%p444_p2)  ;;  %v1924_v27 = vld [vmem:[%s3102_s4 + $0x88] sm:$0xff] (!%p444_p2) }
   0xb   : > { %v2729_v25 = vpack.c.bf16 (!%p444_p2), %v544_v23, %v543_v22  ;;  %v2402_v29 = vpack.c.bf16 (!%p444_p2), %v1924_v27, %v1923_v26  ;;  %v1925_v31 = vld [vmem:[%s3102_s4 + $0x90] sm:$0xff] (!%p444_p2)  ;;  %v1926_v32 = vld [vmem:[%s3102_s4 + $0x98] sm:$0xff] (!%p444_p2)  ;;  %v1927_v34 = vld [vmem:[%s3102_s4 + $0xa0] sm:$0xff] (!%p444_p2) }
   0xc   : > { %2382 = vmatpush3.bf16.msra.mxu0 (!%p444_p2), %v2381_v12  ;;  %v2405_v33 = vpack.c.bf16 (!%p444_p2), %v1926_v32, %v1925_v31  ;;  %v1928_v35 = vld [vmem:[%s3102_s4 + $0xa8] sm:$0xff] (!%p444_p2)  ;;  %v1929_v38 = vld [vmem:[%s3102_s4 + $0xb0] sm:$0xff] (!%p444_p2)  ;;  %v1930_v39 = vld [vmem:[%s3102_s4 + $0xb8] sm:$0xff] (!%p444_p2) }
   0xd   : > { %s3115_s30 = smov (!%p2670_p3, %s1900_s30), 1  ;;  %2394 = vmatpush3.bf16.msra.mxu1 %v2688_v13  ;;  %2383 = vmatprep.subr.bf16.mxu0 %v2562_v3  ;;  %v2408_v36 = vpack.c.bf16 %v1928_v35, %v1927_v34  ;;  %v2411_v42 = vpack.c.bf16 %v1930_v39, %v1929_v38  ;;  %v1936_v47 = vld [vmem:[%s3103_s5 + $0x40] sm:$0xff]  ;;  %v1937_v48 = vld [vmem:[%s3103_s5 + $0x48] sm:$0xff]  ;;  %v1938_v54 = vld [vmem:[%s3103_s5 + $0x50] sm:$0xff] }
   0xe   : > { %2395 = vmatprep.subr.bf16.mxu1 %v2562_v3  ;;  %s1991_s20 = sshll.u32 %s3115_s30, 4  ;;  %v1014_v49 = vld [vmem:[%s3103_s5] sm:$0xff]  ;;  %v1015_v50 = vld [vmem:[%s3103_s5 + $0x8] sm:$0xff]  ;;  %v2450_v51 = vpack.c.bf16 %v1937_v48, %v1936_v47  ;;  %v1939_v55 = vld [vmem:[%s3103_s5 + $0x58] sm:$0xff]  ;;  %s2961_s18 = sshll.u32 %s3115_s30, 3 }
   0xf   : > { %s2734_s23 = scalar_lea.vmem %s3099_s1, %s1991_s20  ;;  %s509_s27 = scalar_lea.vmem %s3098_s0, %s1991_s20  ;;  %v2462_v53 = vpack.c.bf16 %v1015_v50, %v1014_v49  ;;  %v1016_v56 = vld [vmem:[%s3103_s5 + $0x10] sm:$0xff]  ;;  %v1017_v57 = vld [vmem:[%s3103_s5 + $0x18] sm:$0xff]  ;;  %v2453_v58 = vpack.c.bf16 %v1939_v55, %v1938_v54  ;;  %v1940_v60 = vld [vmem:[%s3103_s5 + $0x60] sm:$0xff] }
  0x10   : > { %2385 = vmatpush3.bf16.msra.mxu0 %v2384_v18  ;;  %v2747_v28 = vld [vmem:[%s2734_s23] sm:$0xff]  ;;  %v532_v37 = vld [vmem:[%s509_s27 + $0x8] sm:$0x1]  ;;  %v2465_v59 = vpack.c.bf16 %v1017_v57, %v1016_v56  ;;  %v1942_v2 = vld [vmem:[%s3103_s5 + $0x70] sm:$0xff]  ;;  %s518_s21 = scalar_lea.vmem %s3100_s2, %s2961_s18  ;;  %s522_s30 = scalar_lea.vmem %s3101_s3, %s2961_s18 }
  0x11   : > { %2397 = vmatpush3.bf16.msra.mxu1 %v2711_v19  ;;  %2386 = vmatprep.subr.bf16.mxu0 %v2562_v3  ;;  %v2751_v30 = vld [vmem:[%s509_s27] sm:$0xff]  ;;  %v713_v41 = vrot.slane %v532_v37, 1  ;;  %v534_v44 = vld [vmem:[%s2734_s23 + $0x8] sm:$0x1]  ;;  %v937_v45 = vrot.slane %v2747_v28, 1  ;;  %v1020_v5 = vld [vmem:[%s3103_s5 + $0x30] sm:$0xff]  ;;  %s526_s25 = scalar_lea.vmem %s3111_s13, %s2961_s18  ;;  %s530_s17 = scalar_lea.vmem %s3112_s14, %s2961_s18 }
  0x12   : > { %2398 = vmatprep.subr.bf16.mxu1 %v2562_v3  ;;  %v712_v40 = vrot.slane %v2751_v30, 1  ;;  %v938_v46 = vrot.slane %v534_v44, 1  ;;  %v1941_v61 = vld [vmem:[%s3103_s5 + $0x68] sm:$0xff]  ;;  %v1018_v62 = vld [vmem:[%s3103_s5 + $0x20] sm:$0xff]  ;;  %v1021_v6 = vld [vmem:[%s3103_s5 + $0x38] sm:$0xff] }
  0x13   : > { %v1019_v63 = vld [vmem:[%s3103_s5 + $0x28] sm:$0xff]  ;;  %v2456_v0 = vpack.c.bf16 %v1941_v61, %v1940_v60  ;;  %v1946_v9 = vld [vmem:[%s3103_s5 + $0x80] sm:$0xff]  ;;  %v1949_v14 = vld [vmem:[%s3103_s5 + $0x98] sm:$0xff] }
  0x14   : > { %2388 = vmatpush3.bf16.msra.mxu0 %v2387_v24  ;;  %v2788_v43 = vsel %vm711_vm2, %v712_v40, %v713_v41  ;;  %v939_v52 = vsel %vm711_vm2, %v937_v45, %v938_v46  ;;  %v2468_v1 = vpack.c.bf16 %v1019_v63, %v1018_v62  ;;  %v1947_v10 = vld [vmem:[%s3103_s5 + $0x88] sm:$0xff]  ;;  %v1950_v16 = vld [vmem:[%s3103_s5 + $0xa0] sm:$0xff]  ;;  %v1953_v20 = vld [vmem:[%s3103_s5 + $0xb8] sm:$0xff] }
  0x15   : > { %2400 = vmatpush3.bf16.msra.mxu1 %v2729_v25  ;;  %2401 = vmatprep.subr.bf16.mxu0 %v2562_v3  ;;  %v1951_v17 = vld [vmem:[%s3103_s5 + $0xa8] sm:$0xff]  ;;  %v1956_v22 = vld [vmem:[%s3104_s6 + $0x40] sm:$0xff]  ;;  %v1959_v26 = vld [vmem:[%s3104_s6 + $0x58] sm:$0xff] }
  0x16   : > { %2413 = vmatprep.subr.bf16.mxu1 %v2562_v3  ;;  %v1957_v23 = vld [vmem:[%s3104_s6 + $0x48] sm:$0xff]  ;;  %v1962_v31 = vld [vmem:[%s3104_s6 + $0x70] sm:$0xff]  ;;  %v1963_v32 = vld [vmem:[%s3104_s6 + $0x78] sm:$0xff] }
  0x17   : > { %2133 = vmatmul.mubr.msk.f32.vlgmr.msra.gmra.mrb[0].mxu0 %vm554_vm1, %v2747_v28  ;;  %v1977_v34 = vld [vmem:[%s3105_s7 + $0x20] sm:$0xff]  ;;  %v1978_v35 = vld [vmem:[%s3105_s7 + $0x28] sm:$0xff]  ;;  %v1979_v37 = vld [vmem:[%s3105_s7 + $0x30] sm:$0xff] }
  0x18   : > { %2152 = vmatmul.mubr.msk.f32.vlgmr.msra.gmra.mrb[0].mxu1 %vm554_vm1, %v2751_v30  ;;  %2403 = vmatpush3.bf16.msra.mxu0 %v2402_v29  ;;  %v1980_v38 = vld [vmem:[%s3105_s7 + $0x38] sm:$0xff]  ;;  %v1932_v46 = vld [vmem:[%s3106_s8] ss:$0 sm:$0xff]  ;;  %v1269_v50 = vld [vmem:[%s3104_s6 + $0x8] sm:$0xff] }
  0x19   : > { %2415 = vmatpush3.bf16.msra.mxu1 %v2378_v4  ;;  %2404 = vmatprep.subr.bf16.mxu0 %v2562_v3  ;;  %v1943_v4 = vld [vmem:[%s3103_s5 + $0x78] sm:$0xff]  ;;  %v2525_v39 = vpack.c.bf16 %v1980_v38, %v1979_v37  ;;  %v1268_v49 = vld [vmem:[%s3104_s6] sm:$0xff]  ;;  %v1270_v57 = vld [vmem:[%s3104_s6 + $0x10] sm:$0xff] }
  0x1a   : > { %2416 = vmatprep.subr.bf16.mxu1 %v2562_v3  ;;  %2170 = vmatprep.mubr.msk.f32.mxu0 %vm2563_vm0, %v2564_v11  ;;  %v2459_v7 = vpack.c.bf16 %v1943_v4, %v1942_v2  ;;  %v2498_v55 = vpack.c.bf16 %v1269_v50, %v1268_v49  ;;  %v1272_v60 = vld [vmem:[%s3104_s6 + $0x20] sm:$0xff]  ;;  %v1273_v61 = vld [vmem:[%s3104_s6 + $0x28] sm:$0xff]  ;;  %v1274_v63 = vld [vmem:[%s3104_s6 + $0x30] sm:$0xff] }
  0x1b   : > { %2189 = vmatprep.mubr.msk.f32.mxu1 %vm2563_vm0, %v2564_v11  ;;  %v2504_v62 = vpack.c.bf16 %v1273_v61, %v1272_v60 }
  0x1c   : > { %2406 = vmatpush3.bf16.msra.mxu0 %v2405_v33 }
  0x1d   : > { %2418 = vmatpush3.bf16.msra.mxu1 %v2381_v12  ;;  %2407 = vmatprep.subr.bf16.mxu0 %v2562_v3  ;;  %v2474_v12 = vpack.c.bf16 %v1947_v10, %v1946_v9  ;;  %v536_v9 = vld [vmem:[%s522_s30] sm:$0xff] }
  0x1e   : > { %2419 = vmatprep.subr.bf16.mxu1 %v2562_v3 }
  0x20   : > { %2409 = vmatpush3.bf16.msra.mxu0 %v2408_v36 }
  0x21   : > { %2421 = vmatpush3.bf16.msra.mxu1 %v2384_v18  ;;  %2410 = vmatprep.subr.bf16.mxu0 %v2562_v3  ;;  %v2480_v18 = vpack.c.bf16 %v1951_v17, %v1950_v16  ;;  %v1968_v17 = vld [vmem:[%s3104_s6 + $0x90] sm:$0xff] }
  0x22   : > { %2422 = vmatprep.subr.bf16.mxu1 %v2562_v3 }
  0x24   : > { %2412 = vmatpush3.bf16.msra.mxu0 %v2411_v42 }
  0x25   : > { %2424 = vmatpush3.bf16.msra.mxu1 %v2387_v24  ;;  %2425 = vmatprep.subr.bf16.mxu0 %v2562_v3  ;;  %v1958_v24 = vld [vmem:[%s3104_s6 + $0x50] sm:$0xff] }
  0x26   : > { %2437 = vmatprep.subr.bf16.mxu1 %v2562_v3  ;;  %v2489_v27 = vpack.c.bf16 %v1959_v26, %v1958_v24 }
  0x27   : > { %2171 = vmatmul.mubr.msk.f32.vlgmr.msra.gmra.mrb[2].mxu0 %vm554_vm1, %v2788_v43 }
  0x28   : > { %2427 = vmatpush3.bf16.msra.mxu0 %v2674_v8  ;;  %2190 = vmatmul.mubr.msk.f32.vlgmr.msra.gmra.mrb[2].mxu1 %vm554_vm1, %v2788_v43  ;;  %v2471_v8 = vpack.c.bf16 %v1021_v6, %v1020_v5 }
  0x29   : > { %2439 = vmatpush3.bf16.msra.mxu1 %v2402_v29  ;;  %2428 = vmatprep.subr.bf16.mxu0 %v2562_v3  ;;  %v1961_v29 = vld [vmem:[%s3104_s6 + $0x68] sm:$0xff] }
  0x2a   : > { %2440 = vmatprep.subr.bf16.mxu1 %v2562_v3  ;;  %2208 = vmatprep.mubr.msk.f32.mxu0 %vm2563_vm0, %v2564_v11 }
  0x2b   : > { %2227 = vmatprep.mubr.msk.f32.mxu1 %vm2563_vm0, %v2564_v11 }
  0x2c   : > { %2430 = vmatpush3.bf16.msra.mxu0 %v2688_v13  ;;  %v1948_v13 = vld [vmem:[%s3103_s5 + $0x90] sm:$0xff] }
  0x2d   : > { %2442 = vmatpush3.bf16.msra.mxu1 %v2405_v33  ;;  %2431 = vmatprep.subr.bf16.mxu0 %v2562_v3  ;;  %v2477_v15 = vpack.c.bf16 %v1949_v14, %v1948_v13  ;;  %v2495_v33 = vpack.c.bf16 %v1963_v32, %v1962_v31  ;;  %v1967_v13 = vld [vmem:[%s3104_s6 + $0x88] sm:$0xff]  ;;  %v1534_v32 = vld [vmem:[%s3105_s7] sm:$0xff] }
  0x2e   : > { %2443 = vmatprep.subr.bf16.mxu1 %v2562_v3 }
  0x30   : > { %2433 = vmatpush3.bf16.msra.mxu0 %v2711_v19  ;;  %v1952_v19 = vld [vmem:[%s3103_s5 + $0xb0] sm:$0xff] }
  0x31   : > { %2445 = vmatpush3.bf16.msra.mxu1 %v2408_v36  ;;  %2434 = vmatprep.subr.bf16.mxu0 %v2562_v3  ;;  %v2483_v21 = vpack.c.bf16 %v1953_v20, %v1952_v19  ;;  %v2522_v36 = vpack.c.bf16 %v1978_v35, %v1977_v34  ;;  %v1955_v35 = vld [vmem:[%s3107_s9] ss:$0 sm:$0xff] }
  0x32   : > { %2446 = vmatprep.subr.bf16.mxu1 %v2562_v3 }
  0x34   : > { %2436 = vmatpush3.bf16.msra.mxu0 %v2729_v25  ;;  %v2486_v25 = vpack.c.bf16 %v1957_v23, %v1956_v22  ;;  %v1971_v22 = vld [vmem:[%s3104_s6 + $0xa8] sm:$0xff] }
  0x35   : > { %2448 = vmatpush3.bf16.msra.mxu1 %v2411_v42  ;;  %2449 = vmatprep.subr.bf16.mxu0 %v2562_v3 }
  0x36   : > { %2461 = vmatprep.subr.bf16.mxu1 %v2562_v3 }
  0x37   : > { %2209 = vmatmul.mubr.msk.f32.vlgmr.msra.gmra.mrb[4].mxu0 %vm554_vm1, %v2747_v28 }
  0x38   : > { %2451 = vmatpush3.bf16.msra.mxu0 %v2450_v51  ;;  %2228 = vmatmul.mubr.msk.f32.vlgmr.msra.gmra.mrb[4].mxu1 %vm554_vm1, %v939_v52  ;;  %v535_v52 = vld [vmem:[%s518_s21] sm:$0xff] }
  0x39   : > { %2463 = vmatpush3.bf16.msra.mxu1 %v2462_v53  ;;  %2452 = vmatprep.subr.bf16.mxu0 %v2562_v3 }
  0x3a   : > { %2464 = vmatprep.subr.bf16.mxu1 %v2562_v3  ;;  %2246 = vmatprep.mubr.msk.f32.mxu0 %vm2563_vm0, %v2564_v11 }
  0x3b   : > { %2265 = vmatprep.mubr.msk.f32.mxu1 %vm2563_vm0, %v2564_v11 }
  0x3c   : > { %2454 = vmatpush3.bf16.msra.mxu0 %v2453_v58  ;;  %v1271_v58 = vld [vmem:[%s3104_s6 + $0x18] sm:$0xff] }
  0x3d   : > { %2466 = vmatpush3.bf16.msra.mxu1 %v2465_v59  ;;  %2455 = vmatprep.subr.bf16.mxu0 %v2562_v3  ;;  %v2501_v59 = vpack.c.bf16 %v1271_v58, %v1270_v57  ;;  %v1975_v57 = vld [vmem:[%s3109_s11] ss:$0 sm:$0xff] }
  0x3e   : > { %2467 = vmatprep.subr.bf16.mxu1 %v2562_v3 }
  0x40   : > { %2457 = vmatpush3.bf16.msra.mxu0 %v2456_v0  ;;  %v1275_v0 = vld [vmem:[%s3104_s6 + $0x38] sm:$0xff] }
  0x41   : > { %2469 = vmatpush3.bf16.msra.mxu1 %v2468_v1  ;;  %2458 = vmatprep.subr.bf16.mxu0 %v2562_v3  ;;  %v2507_v2 = vpack.c.bf16 %v1275_v0, %v1274_v63  ;;  %v1988_v63 = vld [vmem:[%s3108_s10] ss:$0 sm:$0xff] }
  0x42   : > { %2470 = vmatprep.subr.bf16.mxu1 %v2562_v3 }
  0x44   : > { %2460 = vmatpush3.bf16.msra.mxu0 %v2459_v7 }
  0x45   : > { %2472 = vmatpush3.bf16.msra.mxu1 %v2471_v8  ;;  %2473 = vmatprep.subr.bf16.mxu0 %v2562_v3 }
  0x46   : > { %2485 = vmatprep.subr.bf16.mxu1 %v2562_v3 }
  0x47   : > { %2247 = vmatmul.mubr.msk.f32.vlgmr.msra.gmra.mrb[6].mxu0 %vm554_vm1, %v2747_v28  ;;  %v1960_v28 = vld [vmem:[%s3104_s6 + $0x60] sm:$0xff] }
  0x48   : > { %2266 = vmatmul.mubr.msk.f32.vlgmr.msra.gmra.mrb[6].mxu1 %vm554_vm1, %v2751_v30  ;;  %2475 = vmatpush3.bf16.msra.mxu0 %v2474_v12  ;;  %v2492_v30 = vpack.c.bf16 %v1961_v29, %v1960_v28  ;;  %v1966_v12 = vld [vmem:[%s3104_s6 + $0x80] sm:$0xff]  ;;  %v1972_v28 = vld [vmem:[%s3104_s6 + $0xb0] sm:$0xff]  ;;  %v1973_v29 = vld [vmem:[%s3104_s6 + $0xb8] sm:$0xff] }
  0x49   : > { %2476 = vmatprep.subr.bf16.mxu0 %v2562_v3  ;;  %2284 = vmatprep.mubr.msk.f32.mxu0 %vm2563_vm0, %v2564_v11  ;;  %v2510_v16 = vpack.c.bf16 %v1967_v13, %v1966_v12  ;;  %v2519_v31 = vpack.c.bf16 %v1973_v29, %v1972_v28 }
  0x4a   : > { %2303 = vmatprep.mubr.msk.f32.mxu1 %vm2563_vm0, %v2564_v11  ;;  %2487 = vmatpush3.bf16.msra.mxu1 %v2486_v25 }
  0x4b   : > { %2488 = vmatprep.subr.bf16.mxu1 %v2562_v3 }
  0x4c   : > { %2478 = vmatpush3.bf16.msra.mxu0 %v2477_v15 }
  0x4d   : > { %2479 = vmatprep.subr.bf16.mxu0 %v2562_v3 }
  0x4e   : > { %2490 = vmatpush3.bf16.msra.mxu1 %v2489_v27 }
  0x4f   : > { %2491 = vmatprep.subr.bf16.mxu1 %v2562_v3 }
  0x50   : > { %2481 = vmatpush3.bf16.msra.mxu0 %v2480_v18  ;;  %v1969_v18 = vld [vmem:[%s3104_s6 + $0x98] sm:$0xff] }
  0x51   : > { %2482 = vmatprep.subr.bf16.mxu0 %v2562_v3  ;;  %v2513_v20 = vpack.c.bf16 %v1969_v18, %v1968_v17 }
  0x52   : > { %2493 = vmatpush3.bf16.msra.mxu1 %v2492_v30 }
  0x53   : > { %2494 = vmatprep.subr.bf16.mxu1 %v2562_v3 }
  0x54   : > { %2484 = vmatpush3.bf16.msra.mxu0 %v2483_v21  ;;  %v1970_v21 = vld [vmem:[%s3104_s6 + $0xa0] sm:$0xff] }
  0x55   : > { %2521 = vmatprep.subr.bf16.mxu0 %v2562_v3  ;;  %v2516_v26 = vpack.c.bf16 %v1971_v22, %v1970_v21 }
  0x56   : > { %2496 = vmatpush3.bf16.msra.mxu1 %v2495_v33  ;;  %v1535_v33 = vld [vmem:[%s3105_s7 + $0x8] sm:$0xff] }
  0x57   : > { %2285 = vmatmul.mubr.msk.f32.vlgmr.msra.gmra.mrb[8].mxu0 %vm554_vm1, %v2788_v43  ;;  %2497 = vmatprep.subr.bf16.mxu1 %v2562_v3  ;;  %v2528_v38 = vpack.c.bf16 %v1535_v33, %v1534_v32 }
  0x58   : > { %2352 = vmatprep.mubr.msk.f32.mxu0 %vm2563_vm0, %v2564_v11  ;;  %2523 = vmatpush3.bf16.msra.mxu0 %v2522_v36 }
  0x59   : > { %2524 = vmatprep.subr.bf16.mxu0 %v2562_v3 }
  0x5c   : > { %2526 = vmatpush3.bf16.msra.mxu0 %v2525_v39 }
  0x5d   : > { %2527 = vmatprep.subr.bf16.mxu0 %v2562_v3 }
  0xea   : > { %v624_v40 = vpop.f32.mrb[0].mxu0 }
  0xeb   : > { %v2134_v41 = vpop.f32.mrb[1].mxu0  ;;  %v697_v42 = vpop.f32.mrb[0].mxu1 }
  0xec   : > { %v698_v43 = vadd.f32 %v697_v42, %v624_v40  ;;  %v2153_v44 = vpop.f32.mrb[1].mxu1  ;;  %v1536_v40 = vld [vmem:[%s3105_s7 + $0x10] sm:$0xff]  ;;  %v1537_v41 = vld [vmem:[%s3105_s7 + $0x18] sm:$0xff] }
  0xed   : > { %v2531_v42 = vpack.c.bf16 %v1537_v41, %v1536_v40  ;;  %v1984_v44 = vld [vmem:[%s3105_s7 + $0x48] sm:$0xff] }
  0xfa   : > { %v783_v45 = vpop.f32.mrb[2].mxu0 }
  0xfb   : > { %v787_v47 = vadd.f32 %v783_v45, %v698_v43  ;;  %v2172_v48 = vpop.f32.mrb[3].mxu0  ;;  %v862_v51 = vpop.f32.mrb[2].mxu1  ;;  %v1983_v43 = vld [vmem:[%s3105_s7 + $0x40] sm:$0xff] }
  0xfc   : > { %v2191_v53 = vpop.f32.mrb[3].mxu1  ;;  %v1986_v48 = vld [vmem:[%s3105_s7 + $0x58] sm:$0xff] }
  0xfd   : > { %v795_v54 = vadd.f32 %v1932_v46, %v787_v47  ;;  %v1985_v47 = vld [vmem:[%s3105_s7 + $0x50] sm:$0xff] }
  0xfe   : > { %v2537_v50 = vpack.c.bf16 %v1986_v48, %v1985_v47 }
  0xff   : > { %v1261_v56 = vsub.f32 %v535_v52, %v795_v54 }
 0x101   : > { %2304 = vmatmul.mubr.msk.f32.vlgmr.msra.gmra.mrb[8].mxu1 %vm554_vm1, %v1261_v56 }
 0x102   : > { %2499 = vmatpush3.bf16.msra.mxu1 %v2498_v55  ;;  %2322 = vmatprep.mubr.msk.f32.mxu1 %vm2563_vm0, %v2564_v11 }
 0x103   : > { %2500 = vmatprep.subr.bf16.mxu1 %v2562_v3 }
 0x106   : > { %2502 = vmatpush3.bf16.msra.mxu1 %v2501_v59 }
 0x107   : > { %2503 = vmatprep.subr.bf16.mxu1 %v2562_v3 }
 0x10a   : > { %v932_v1 = vpop.f32.mrb[4].mxu0  ;;  %2505 = vmatpush3.bf16.msra.mxu1 %v2504_v62 }
 0x10b   : > { %v933_v4 = vadd.f32 %v932_v1, %v862_v51  ;;  %v2210_v5 = vpop.f32.mrb[5].mxu0  ;;  %v1008_v6 = vpop.f32.mrb[4].mxu1  ;;  %2506 = vmatprep.subr.bf16.mxu1 %v2562_v3 }
 0x10c   : > { %v2229_v7 = vpop.f32.mrb[5].mxu1 }
 0x10d   : > { %v1012_v8 = vadd.f32 %v1008_v6, %v933_v4 }
 0x10e   : > { %2508 = vmatpush3.bf16.msra.mxu1 %v2507_v2 }
 0x10f   : > { %v1013_v10 = vadd.f32 %v1932_v46, %v1012_v8  ;;  %2509 = vmatprep.subr.bf16.mxu1 %v2562_v3  ;;  %v2534_v46 = vpack.c.bf16 %v1984_v44, %v1983_v43 }
 0x111   : > { %v1262_v14 = vsub.f32 %v536_v9, %v1013_v10 }
 0x113   : > { %v1264_v15 = vrot.slane %v1262_v14, 7 }
 0x115   : > { %v1267_v19 = vsel %vm1266_vm3, 0.0, %v1264_v15 }
 0x116   : > { %2323 = vmatmul.mubr.msk.f32.vlgmr.msra.gmra.mrb[8].mxu1 %vm554_vm1, %v1267_v19 }
 0x117   : > { %2511 = vmatpush3.bf16.msra.mxu1 %v2510_v16  ;;  %2341 = vmatprep.mubr.msk.f32.mxu1 %vm2563_vm0, %v2564_v11 }
 0x118   : > { %2512 = vmatprep.subr.bf16.mxu1 %v2562_v3 }
 0x11a   : > { %v1097_v23 = vpop.f32.mrb[6].mxu0 }
 0x11b   : > { %2514 = vmatpush3.bf16.msra.mxu1 %v2513_v20  ;;  %v2248_v24 = vpop.f32.mrb[7].mxu0  ;;  %v1167_v25 = vpop.f32.mrb[6].mxu1 }
 0x11c   : > { %v1168_v27 = vadd.f32 %v1167_v25, %v1097_v23  ;;  %2515 = vmatprep.subr.bf16.mxu1 %v2562_v3  ;;  %v2267_v30 = vpop.f32.mrb[7].mxu1 }
 0x11f   : > { %2517 = vmatpush3.bf16.msra.mxu1 %v2516_v26 }
 0x120   : > { %2518 = vmatprep.subr.bf16.mxu1 %v2562_v3 }
 0x123   : > { %2520 = vmatpush3.bf16.msra.mxu1 %v2519_v31 }
 0x126   : > { %2342 = vmatmul.mubr.msk.f32.vlgmr.msra.gmra.mrb[8].mxu1 %vm554_vm1, %v1262_v14 }
 0x12a   : > { %v1246_v34 = vpop.f32.mrb[8].mxu0 }
 0x12b   : > { %v1250_v36 = vadd.f32 %v1246_v34, %v1168_v27  ;;  %v2286_v37 = vpop.f32.mrb[9].mxu0 }
 0x12d   : > { %v1258_v39 = vadd.f32 %v1955_v35, %v1250_v36 }
 0x12f   : > { %1260 = vst.msk [vmem:[%s526_s25] sm:$0xff] %vm1259_vm4, %v1258_v39  ;;  %2353 = vmatmul.mubr.msk.f32.vlgmr.msra.gmra.mrb[10].mxu0 %vm1259_vm4, %v1258_v39  ;;  %v1531_v45 = vrot.slane %v1258_v39, 7  ;;  %v1688_v51 = vrot.slane %v1258_v39, 1 }
 0x130   : > { %2529 = vmatpush3.bf16.msra.mxu0 %v2528_v38  ;;  %2363 = vmatprep.mubr.msk.f32.mxu0 %vm2563_vm0, %v2564_v11 }
 0x131   : > { %2530 = vmatprep.subr.bf16.mxu0 %v2562_v3  ;;  %v1533_v49 = vsel %vm1266_vm3, 0.0, %v1531_v45  ;;  %v1690_v52 = vsel %vm711_vm2, %v1688_v51, 0.0 }
 0x134   : > { %2532 = vmatpush3.bf16.msra.mxu0 %v2531_v42 }
 0x135   : > { %2533 = vmatprep.subr.bf16.mxu0 %v2562_v3 }
 0x137   : > { %2364 = vmatmul.mubr.msk.f32.vlgmr.msra.gmra.mrb[12].mxu0 %vm1259_vm4, %v1533_v49 }
 0x138   : > { %2535 = vmatpush3.bf16.msra.mxu0 %v2534_v46  ;;  %2374 = vmatprep.mubr.msk.f32.mxu0 %vm2563_vm0, %v2564_v11 }
 0x139   : > { %2536 = vmatprep.subr.bf16.mxu0 %v2562_v3  ;;  %v1976_v3 = vld [vmem:[%s3110_s12] ss:$0 sm:$0xff] }
 0x13c   : > { %2538 = vmatpush3.bf16.msra.mxu0 %v2537_v50 }
 0x13f   : > { %2375 = vmatmul.mubr.msk.f32.vlgmr.msra.gmra.mrb[14].mxu0 %vm1259_vm4, %v1690_v52 }
 0x1f9   : > { %v1508_v53 = vpop.f32.mrb[8].mxu1 }
 0x1fa   : > { %v2343_v54 = vpop.f32.mrb[9].mxu1  ;;  %v1520_v60 = vmul.f32 %v1975_v57, %v1508_v53 }
 0x1fc   : > { %v1528_v61 = vadd.f32 %v1976_v3, %v1520_v60 }
 0x1fe   : > { %v1529_v2 = vmax.f32 %v1528_v61, 0.0 }
 0x202   : > { %v1611_v55 = vpop.f32.mrb[10].mxu0 }
 0x203   : > { %v2354_v56 = vpop.f32.mrb[11].mxu0 }
 0x20a   : > { %v1684_v58 = vpop.f32.mrb[12].mxu0 }
 0x20b   : > { %v1685_v59 = vadd.f32 %v1684_v58, %v1611_v55  ;;  %v2365_v11 = vpop.f32.mrb[13].mxu0 }
 0x212   : > { %v1765_v62 = vpop.f32.mrb[14].mxu0 }
 0x213   : > { %v1769_v0 = vadd.f32 %v1765_v62, %v1685_v59  ;;  %v2376_v1 = vpop.f32.mrb[15].mxu0 }
 0x215   : > { %v1777_v4 = vadd.f32 %v1988_v63, %v1769_v0 }
 0x217   : > { %v1778_v5 = vadd.f32 %v1777_v4, %v1529_v2 }
 0x219   : > { %1779 = vst.msk [vmem:[%s530_s17] sm:$0xff] %vm1259_vm4, %v1778_v5 }
 0x21a PF: > { %s25_s29 = sadd.s32 1, %s2560_s29  }
 0x21b   : > { %p22_p4 = scmp.ge.s32.totalorder %s25_s29, 4  }
 0x21d   :  { %24 = sbr.rel (!%p22_p4) target bundleno = 1 (0x1), region = 131 }

</bundles_post_ra>
